<compile_context>
chip_gen: v5e
topology: v5e:2x2
jax: 0.10.0
libtpu: 0.0.40
codegen_flags: <defaults>
</compile_context>

<pallas_src>
import functools

import jax
import jax.numpy as jnp
from jax.experimental import pallas as pl
from jax.experimental.pallas import tpu as pltpu


def _mdm_kernel(xt_ref, w1t_ref, b1_ref, w2t_ref, b2_ref, out_ref,
                *, out_dim, approx_recip):
    """One batch tile (batch on lanes):
       e = relu(W2^T @ relu(W1^T @ x^T + b1) + b2)            [2O, TM]
       scores = sum(e[:O] * e[O:], axis=0)                     [1, TM]
       out = sigmoid(scores)                                   lane-dense row
    Matmuls run at the operand dtype (bf16 / f32) with f32 accumulation;
    all elementwise math stays in f32."""
    # Fused encoder layer 1 (block-diagonal): [2H, Dd+Dm] @ [Dd+Dm, TM].
    h = jnp.dot(w1t_ref[...], xt_ref[...], preferred_element_type=jnp.float32)
    h = jnp.maximum(h + b1_ref[...], 0.0)                     # [2H, TM] f32

    # Fused encoder layer 2: [2O, 2H] @ [2H, TM].
    e = jnp.dot(w2t_ref[...], h.astype(w2t_ref.dtype),
                preferred_element_type=jnp.float32)
    e = jnp.maximum(e + b2_ref[...], 0.0)                     # [2O, TM] f32

    # Pairwise dot of the disease / microbe halves: sublane slices + reduce.
    scores = jnp.sum(e[:out_dim, :] * e[out_dim:, :], axis=0,
                     keepdims=True)                           # [1, TM] f32

    # Numerically stable sigmoid; exp + reciprocal go to the EUP slot.
    z = jnp.exp(-jnp.abs(scores))
    inv = pl.reciprocal(1.0 + z, approx=approx_recip)
    out_ref[...] = jnp.where(scores >= 0.0, inv, z * inv)


def prepare_params(params, compute_dtype=jnp.bfloat16):
    """Build the fused, transposed, block-diagonal weights ONCE (hoisted out
    of the per-call forward).  Weights are pre-cast to the matmul dtype;
    biases stay f32 (column vectors for the transposed orientation)."""
    wd1, bd1, wd2, bd2, wm1, bm1, wm2, bm2 = params
    d_dim, hid = wd1.shape
    m_dim = wm1.shape[0]
    out_dim = wd2.shape[1]

    w1t = jnp.zeros((2 * hid, d_dim + m_dim), jnp.float32)
    w1t = w1t.at[:hid, :d_dim].set(wd1.T).at[hid:, d_dim:].set(wm1.T)
    b1t = jnp.concatenate([bd1, bm1], axis=1).T               # [2H, 1]

    w2t = jnp.zeros((2 * out_dim, 2 * hid), jnp.float32)
    w2t = w2t.at[:out_dim, :hid].set(wd2.T).at[out_dim:, hid:].set(wm2.T)
    b2t = jnp.concatenate([bd2, bm2], axis=1).T               # [2O, 1]

    return (w1t.astype(compute_dtype), b1t, w2t.astype(compute_dtype), b2t)


@functools.partial(jax.jit, static_argnames=("tm_max",))
def microbe_disease_forward(disease_features, microbe_features,
                            w1t, b1t, w2t, b2t, *, tm_max=2048):
    """Fused forward pass for arbitrary batch size.

    w1t/b1t/w2t/b2t come from prepare_params (fused + pre-cast once).  The
    jit around this wrapper fuses the x transpose / pad / cast into a single
    producer fusion before the kernel."""
    B = disease_features.shape[0]
    feat = w1t.shape[1]
    out_dim = w2t.shape[0] // 2
    compute_dtype = w1t.dtype

    # Lane-axis batch tile: multiple of 128, capped at tm_max, and sized so
    # the grid has >=2 steps when the batch allows it (v7x has 2 TensorCores).
    half = -(-B // 2)
    tm = min(tm_max, max(128, ((half + 127) // 128) * 128))
    b_pad = ((B + tm - 1) // tm) * tm
    grid = (b_pad // tm,)

    # x^T [feat, B_pad] in the matmul dtype (zero-padded lanes are discarded
    # after the kernel).
    xt = jnp.concatenate([disease_features.T, microbe_features.T],
                         axis=0).astype(compute_dtype)
    if b_pad != B:
        xt = jnp.pad(xt, ((0, 0), (0, b_pad - B)))

    in_specs = [
        pl.BlockSpec((feat, tm), lambda i: (0, i)),            # x^T: lane-tiled
        pl.BlockSpec(w1t.shape, lambda i: (0, 0)),             # VMEM-resident
        pl.BlockSpec(b1t.shape, lambda i: (0, 0)),
        pl.BlockSpec(w2t.shape, lambda i: (0, 0)),
        pl.BlockSpec(b2t.shape, lambda i: (0, 0)),
    ]
    out_specs = pl.BlockSpec((1, tm), lambda i: (0, i))        # lane-dense row

    out = pl.pallas_call(
        functools.partial(_mdm_kernel, out_dim=out_dim,
                          approx_recip=bool(compute_dtype != jnp.float32)),
        grid=grid,
        in_specs=in_specs,
        out_specs=out_specs,
        out_shape=jax.ShapeDtypeStruct((1, b_pad), jnp.float32),
        compiler_params=pltpu.CompilerParams(
            dimension_semantics=("parallel",)),
    )(xt, w1t, b1t, w2t, b2t)

    return out[0, :B]


def init_params(key, disease_dim, microbe_dim, hidden_dim, output_dim):
    """Deterministic synthetic parameter init (PyTorch-style uniform fan-in).
    Weights stored as [in_dim, out_dim] (pre-transposed for x @ W)."""
    keys = jax.random.split(key, 8)

    def linear(kw, kb, fan_in, fan_out):
        bound = 1.0 / jnp.sqrt(jnp.float32(fan_in))
        w = jax.random.uniform(kw, (fan_in, fan_out), jnp.float32, -bound, bound)
        b = jax.random.uniform(kb, (1, fan_out), jnp.float32, -bound, bound)
        return w, b

    wd1, bd1 = linear(keys[0], keys[1], disease_dim, hidden_dim)
    wd2, bd2 = linear(keys[2], keys[3], hidden_dim, output_dim)
    wm1, bm1 = linear(keys[4], keys[5], microbe_dim, hidden_dim)
    wm2, bm2 = linear(keys[6], keys[7], hidden_dim, output_dim)
    return (wd1, bd1, wd2, bd2, wm1, bm1, wm2, bm2)


def reference_forward(disease_features, microbe_features, params):
    """Pure-JAX reference replicating the PyTorch module semantics."""
    wd1, bd1, wd2, bd2, wm1, bm1, wm2, bm2 = params
    ed = jax.nn.relu(jax.nn.relu(disease_features @ wd1 + bd1) @ wd2 + bd2)
    em = jax.nn.relu(jax.nn.relu(microbe_features @ wm1 + bm1) @ wm2 + bm2)
    return jax.nn.sigmoid(jnp.sum(ed * em, axis=1))


if __name__ == "__main__":
    # Small shapes consistent with the module's forward:
    # disease_features [B, disease_dim], microbe_features [B, microbe_dim].
    B, disease_dim, microbe_dim, hidden_dim, output_dim = 8, 16, 24, 32, 16

    key = jax.random.PRNGKey(0)
    k_dis, k_mic, k_par, k_dis2, k_mic2 = jax.random.split(key, 5)
    disease_features = jax.random.normal(k_dis, (B, disease_dim), jnp.float32)
    microbe_features = jax.random.normal(k_mic, (B, microbe_dim), jnp.float32)
    params = init_params(k_par, disease_dim, microbe_dim, hidden_dim, output_dim)

    ref = reference_forward(disease_features, microbe_features, params)

    # f32 matmul path: tight check against the reference (validation only).
    prep_f32 = prepare_params(params, compute_dtype=jnp.float32)
    out_f32 = microbe_disease_forward(disease_features, microbe_features,
                                      *prep_f32)
    out_f32 = jax.block_until_ready(out_f32)
    assert out_f32.shape == (B,)
    assert jnp.allclose(out_f32, ref, atol=1e-4, rtol=1e-4), (out_f32, ref)

    # bf16 matmul path (MXU-native on v5e/v6e/v7x): looser tolerance.
    prep_bf16 = prepare_params(params, compute_dtype=jnp.bfloat16)
    out_bf16 = microbe_disease_forward(disease_features, microbe_features,
                                       *prep_bf16)
    out_bf16 = jax.block_until_ready(out_bf16)
    assert jnp.allclose(out_bf16, ref, atol=3e-2, rtol=3e-2), (out_bf16, ref)

    # Larger batch exercising the multi-step (>=2) lane-tiled grid + padding.
    Bb = 700
    dis_b = jax.random.normal(k_dis2, (Bb, disease_dim), jnp.float32)
    mic_b = jax.random.normal(k_mic2, (Bb, microbe_dim), jnp.float32)
    ref_b = reference_forward(dis_b, mic_b, params)
    out_b = microbe_disease_forward(dis_b, mic_b, *prep_bf16)
    out_b = jax.block_until_ready(out_b)
    assert out_b.shape == (Bb,)
    assert jnp.allclose(out_b, ref_b, atol=3e-2, rtol=3e-2)

    print("KERNEL_OK")
</pallas_src>

<mosaic_0001>
module attributes {stable_mosaic.version = 11 : i64} {
  func.func @_mdm_kernel(%arg0: i32, %arg1: memref<40x128xf32, #tpu.memory_space<vmem>>, %arg2: memref<64x40xf32, #tpu.memory_space<vmem>>, %arg3: memref<64x1xf32, #tpu.memory_space<vmem>>, %arg4: memref<32x64xf32, #tpu.memory_space<vmem>>, %arg5: memref<32x1xf32, #tpu.memory_space<vmem>>, %arg6: memref<1x128xf32, #tpu.memory_space<vmem>>) attributes {dimension_semantics = [#tpu.dimension_semantics<parallel>], iteration_bounds = array<i64: 1>, scalar_prefetch = 0 : i64, scratch_operands = 0 : i64, tpu.core_type = #tpu.core_type<tc>, window_params = [{transform_indices = @transform_0, window_bounds = array<i64: 40, 128>}, {pipeline_mode = #tpu.pipeline_mode<synchronous>, transform_indices = @transform_1, window_bounds = array<i64: 64, 40>}, {pipeline_mode = #tpu.pipeline_mode<synchronous>, transform_indices = @transform_2, window_bounds = array<i64: 64, 1>}, {pipeline_mode = #tpu.pipeline_mode<synchronous>, transform_indices = @transform_3, window_bounds = array<i64: 32, 64>}, {pipeline_mode = #tpu.pipeline_mode<synchronous>, transform_indices = @transform_4, window_bounds = array<i64: 32, 1>}, {transform_indices = @transform_5, window_bounds = array<i64: 1, 128>}]} {
    %c0 = arith.constant 0 : index
    %c0_0 = arith.constant 0 : index
    %0 = vector.load %arg2[%c0, %c0_0] : memref<64x40xf32, #tpu.memory_space<vmem>>, vector<64x40xf32>
    %c0_1 = arith.constant 0 : index
    %c0_2 = arith.constant 0 : index
    %1 = vector.load %arg1[%c0_1, %c0_2] : memref<40x128xf32, #tpu.memory_space<vmem>>, vector<40x128xf32>
    %cst = arith.constant dense<0.000000e+00> : vector<64x128xf32>
    %2 = tpu.matmul %0, %1, %cst {dimension_numbers = #tpu.dot_dimension_numbers<[1], [0], [0], [1], [0, 0, 1, 1], [], []>} : vector<64x40xf32>, vector<40x128xf32>, vector<64x128xf32> -> vector<64x128xf32>
    %c0_3 = arith.constant 0 : index
    %c0_4 = arith.constant 0 : index
    %3 = vector.load %arg3[%c0_3, %c0_4] : memref<64x1xf32, #tpu.memory_space<vmem>>, vector<64x1xf32>
    %4 = vector.broadcast %3 : vector<64x1xf32> to vector<64x128xf32>
    %5 = arith.addf %2, %4 : vector<64x128xf32>
    %cst_5 = arith.constant 0.000000e+00 : f32
    %6 = vector.broadcast %cst_5 : f32 to vector<64x128xf32>
    %7 = arith.maximumf %5, %6 : vector<64x128xf32>
    %c0_6 = arith.constant 0 : index
    %c0_7 = arith.constant 0 : index
    %8 = vector.load %arg4[%c0_6, %c0_7] : memref<32x64xf32, #tpu.memory_space<vmem>>, vector<32x64xf32>
    %cst_8 = arith.constant dense<0.000000e+00> : vector<32x128xf32>
    %9 = tpu.matmul %8, %7, %cst_8 {dimension_numbers = #tpu.dot_dimension_numbers<[1], [0], [0], [1], [0, 0, 1, 1], [], []>} : vector<32x64xf32>, vector<64x128xf32>, vector<32x128xf32> -> vector<32x128xf32>
    %c0_9 = arith.constant 0 : index
    %c0_10 = arith.constant 0 : index
    %10 = vector.load %arg5[%c0_9, %c0_10] : memref<32x1xf32, #tpu.memory_space<vmem>>, vector<32x1xf32>
    %11 = vector.broadcast %10 : vector<32x1xf32> to vector<32x128xf32>
    %12 = arith.addf %9, %11 : vector<32x128xf32>
    %cst_11 = arith.constant 0.000000e+00 : f32
    %13 = vector.broadcast %cst_11 : f32 to vector<32x128xf32>
    %14 = arith.maximumf %12, %13 : vector<32x128xf32>
    %15 = vector.extract_strided_slice %14 {offsets = [0, 0], sizes = [16, 128], strides = [1, 1]} : vector<32x128xf32> to vector<16x128xf32>
    %16 = vector.extract_strided_slice %14 {offsets = [16, 0], sizes = [16, 128], strides = [1, 1]} : vector<32x128xf32> to vector<16x128xf32>
    %17 = arith.mulf %15, %16 : vector<16x128xf32>
    %cst_12 = arith.constant dense<0.000000e+00> : vector<128xf32>
    %18 = vector.multi_reduction <add>, %17, %cst_12 [0] : vector<16x128xf32> to vector<128xf32>
    %19 = vector.shape_cast %18 : vector<128xf32> to vector<1x128xf32>
    %20 = math.absf %19 : vector<1x128xf32>
    %cst_13 = arith.constant 0.000000e+00 : f32
    %21 = vector.broadcast %cst_13 : f32 to vector<1x128xf32>
    %22 = arith.subf %21, %20 : vector<1x128xf32>
    %23 = math.exp %22 : vector<1x128xf32>
    %cst_14 = arith.constant 1.000000e+00 : f32
    %24 = vector.broadcast %cst_14 : f32 to vector<1x128xf32>
    %25 = arith.addf %24, %23 : vector<1x128xf32>
    %26 = tpu.reciprocal %25 : vector<1x128xf32> -> vector<1x128xf32>
    %cst_15 = arith.constant 0.000000e+00 : f32
    %27 = vector.broadcast %cst_15 : f32 to vector<1x128xf32>
    %28 = arith.cmpf oge, %19, %27 : vector<1x128xf32>
    %29 = arith.mulf %23, %26 : vector<1x128xf32>
    %30 = arith.select %28, %26, %29 : vector<1x128xi1>, vector<1x128xf32>
    %c0_16 = arith.constant 0 : index
    %c0_17 = arith.constant 0 : index
    %31 = vector.load %arg6[%c0_16, %c0_17] : memref<1x128xf32, #tpu.memory_space<vmem>>, vector<1x128xf32>
    tpu.vector_store %arg6[%c0_16, %c0_17], %30 {strides = array<i32>} : memref<1x128xf32, #tpu.memory_space<vmem>>, vector<1x128xf32>,
    return
  }
  func.func @transform_0(%arg0: i32) -> (i32, i32) {
    %c0_i32 = arith.constant 0 : i32
    %c0_i32_0 = arith.constant 0 : i32
    return %c0_i32, %arg0 : i32, i32
  }
  func.func @transform_1(%arg0: i32) -> (i32, i32) {
    %c0_i32 = arith.constant 0 : i32
    %c0_i32_0 = arith.constant 0 : i32
    %c0_i32_1 = arith.constant 0 : i32
    return %c0_i32, %c0_i32_0 : i32, i32
  }
  func.func @transform_2(%arg0: i32) -> (i32, i32) {
    %c0_i32 = arith.constant 0 : i32
    %c0_i32_0 = arith.constant 0 : i32
    %c0_i32_1 = arith.constant 0 : i32
    return %c0_i32, %c0_i32_0 : i32, i32
  }
  func.func @transform_3(%arg0: i32) -> (i32, i32) {
    %c0_i32 = arith.constant 0 : i32
    %c0_i32_0 = arith.constant 0 : i32
    %c0_i32_1 = arith.constant 0 : i32
    return %c0_i32, %c0_i32_0 : i32, i32
  }
  func.func @transform_4(%arg0: i32) -> (i32, i32) {
    %c0_i32 = arith.constant 0 : i32
    %c0_i32_0 = arith.constant 0 : i32
    %c0_i32_1 = arith.constant 0 : i32
    return %c0_i32, %c0_i32_0 : i32, i32
  }
  func.func @transform_5(%arg0: i32) -> (i32, i32) {
    %c0_i32 = arith.constant 0 : i32
    %c0_i32_0 = arith.constant 0 : i32
    return %c0_i32, %arg0 : i32, i32
  }
}

</mosaic_0001>

<bundles_post_ra>
// kernel: microbe_disease_forward.1
= control target key start
LH: loop header
LB: loop body
LE: loop exit
PB: predicated region body
PF: predicated region fallthrough
CT: control target
= control target key end

     0   :  { %v303_v2 = vmov 0   ;;  %vm81_vm0 = vcmask 326656   ;;  %vm183_vm1 = vcmask 523264   ;;  %s432_s0 = inlined_call_operand.vmem [shape: f32[40,128], index: 0, kind: input, shape index: {}]   ;;  %s433_s2 = inlined_call_operand.vmem [shape: f32[64,1], index: 2, kind: input, shape index: {}]   ;;  %s434_s1 = inlined_call_operand.vmem [shape: f32[64,40], index: 1, kind: input, shape index: {}]   ;;  %s435_s4 = inlined_call_operand.vmem [shape: f32[32,1], index: 4, kind: input, shape index: {}]   ;;  %s436_s3 = inlined_call_operand.vmem [shape: f32[32,64], index: 3, kind: input, shape index: {}]   ;;  %s437_s5 = inlined_call_operand.vmem [shape: f32[1,128], index: 5, kind: output, shape index: {}]  }
   0x1   :  { %v32_v0 = vld [vmem:[%s432_s0 + $0x20] sm:$0xff]  ;;  %v31_v1 = vld [vmem:[%s432_s0 + $0x18] sm:$0xff]  ;;  %297 = vset.pattern.permute.xlu1 %v303_v2  ;;  %296 = vset.pattern.permute.xlu0 %v303_v2  ;;  %v30_v3 = vld [vmem:[%s432_s0 + $0x10] sm:$0xff] }
   0x2   :  { %278 = vmatpush.msra.mxu3 %v32_v0  ;;  %117 = vmatpush.msra.mxu0 %v32_v0  ;;  %v38_v4 = vld [vmem:[%s433_s2 + $0x28] sm:$0xff]  ;;  %v40_v5 = vld [vmem:[%s433_s2 + $0x38] sm:$0xff]  ;;  %v28_v7 = vld [vmem:[%s432_s0] sm:$0xff] }
   0x3   :  { %277 = vmatpush.msra.mxu2 %v32_v0  ;;  %298 = vset.pattern.permute.xlu2 %v303_v2  ;;  %v29_v6 = vld [vmem:[%s432_s0 + $0x8] sm:$0xff]  ;;  %v24_v8 = vld [vmem:[%s434_s1 + $0x20] sm:$0xff]  ;;  %v36_v9 = vld [vmem:[%s433_s2 + $0x18] sm:$0xff] }
   0x4   :  { %280 = vmatpush.msra.mxu3 %v31_v1  ;;  %68 = vperm.xlu1 %297, %v38_v4   ;;  %v20_v10 = vld [vmem:[%s434_s1] sm:$0xff]  ;;  %v39_v12 = vld [vmem:[%s433_s2 + $0x30] sm:$0xff]  ;;  %v23_v13 = vld [vmem:[%s434_s1 + $0x18] sm:$0xff] }
   0x5   :  { %118 = vmatpush.msra.mxu0 %v31_v1  ;;  %78 = vperm.xlu0 %296, %v40_v5   ;;  %v37_v11 = vld [vmem:[%s433_s2 + $0x20] sm:$0xff]  ;;  %v35_v14 = vld [vmem:[%s433_s2 + $0x10] sm:$0xff]  ;;  %v25_v15 = vld [vmem:[%s434_s1 + $0x28] sm:$0xff] }
   0x6   :  { %282 = vmatpush.msra.mxu3 %v30_v3  ;;  %279 = vmatpush.msra.mxu2 %v31_v1  ;;  %v21_v16 = vld [vmem:[%s434_s1 + $0x8] sm:$0xff]  ;;  %v33_v17 = vld [vmem:[%s433_s2] sm:$0xff]  ;;  %v26_v20 = vld [vmem:[%s434_s1 + $0x30] sm:$0xff] }
   0x7   :  { %119 = vmatpush.msra.mxu0 %v30_v3  ;;  %58 = vperm.xlu2 %298, %v36_v9   ;;  %v34_v18 = vld [vmem:[%s433_s2 + $0x8] sm:$0xff]  ;;  %v159_v19 = vld [vmem:[%s435_s4] sm:$0xff]  ;;  %v22_v21 = vld [vmem:[%s434_s1 + $0x10] sm:$0xff] }
   0x8   :  { %284 = vmatpush.msra.mxu3 %v29_v6  ;;  %281 = vmatpush.msra.mxu2 %v30_v3  ;;  %v161_v22 = vld [vmem:[%s435_s4 + $0x10] sm:$0xff]  ;;  %v160_v23 = vld [vmem:[%s435_s4 + $0x8] sm:$0xff]  ;;  %v162_v24 = vld [vmem:[%s435_s4 + $0x18] sm:$0xff] }
   0x9   :  { %120 = vmatpush.msra.mxu0 %v29_v6  ;;  %v27_v25 = vld [vmem:[%s434_s1 + $0x38] sm:$0xff]  ;;  %v155_v58 = vld [vmem:[%s436_s3] sm:$0xff]  ;;  %v156_v60 = vld [vmem:[%s436_s3 + $0x8] sm:$0xff] }
   0xa   :  { %286 = vmatpush.msra.mxu3 %v28_v7  ;;  %283 = vmatpush.msra.mxu2 %v29_v6  ;;  %v158_v59 = vld [vmem:[%s436_s3 + $0x18] sm:$0xff]  ;;  %v157_v61 = vld [vmem:[%s436_s3 + $0x10] sm:$0xff] }
   0xb   :  { %269 = vmatmul.msk.f32.vlgmr.msra.gmra.mxu3 %vm81_vm0, %v24_v8  ;;  %121 = vmatpush.msra.mxu0 %v28_v7 }
   0xc   :  { %265 = vmatmul.msk.f32.vlgmr.msra.gmra.mxu0 %vm81_vm0, %v20_v10  ;;  %63 = vperm.xlu1 %297, %v37_v11  }
   0xd   :  { %73 = vperm.xlu0 %296, %v39_v12   ;;  %285 = vmatpush.msra.mxu2 %v28_v7 }
   0xe   :  { %268 = vmatmul.msk.f32.vlgmr.msra.gmra.mxu2 %vm81_vm0, %v23_v13 }
   0xf   :  { %53 = vperm.xlu2 %298, %v35_v14  }
  0x13   :  { %270 = vmatmul.msk.f32.gmra.mxu3 %vm81_vm0, %v25_v15 }
  0x14   :  { %266 = vmatmul.msk.f32.gmra.mxu0 %vm81_vm0, %v21_v16  ;;  %43 = vperm.xlu1 %297, %v33_v17  }
  0x15   :  { %48 = vperm.xlu0 %296, %v34_v18  }
  0x17   :  { %165 = vperm.xlu2 %298, %v159_v19  }
  0x1b   :  { %271 = vmatmul.msk.f32.gmra.mxu3 %vm81_vm0, %v26_v20 }
  0x1c   :  { %267 = vmatmul.msk.f32.gmra.mxu0 %vm81_vm0, %v22_v21  ;;  %175 = vperm.xlu1 %297, %v161_v22  }
  0x1d   :  { %170 = vperm.xlu0 %296, %v160_v23  }
  0x1f   :  { %180 = vperm.xlu2 %298, %v162_v24  }
  0x23   :  { %272 = vmatmul.msk.f32.gmra.mxu3 %vm81_vm0, %v27_v25 }
  0x61   :  { %v59_v33 = vpop.permute.xlu2 %58 }
  0x69   :  { %v54_v47 = vpop.permute.xlu2 %53 }
  0x71   :  { %v166_v63 = vpop.permute.xlu2 %165 }
  0x76   :  { %v69_v30 = vpop.permute.xlu1 %68 }
  0x77   :  { %v79_v29 = vpop.permute.xlu0 %78 }
  0x79   :  { %v181_v4 = vpop.permute.xlu2 %180 }
  0x7e   :  { %v64_v38 = vpop.permute.xlu1 %63 }
  0x7f   :  { %v74_v34 = vpop.permute.xlu0 %73 }
  0x86   :  { %v44_v53 = vpop.permute.xlu1 %43 }
  0x87   :  { %v49_v50 = vpop.permute.xlu0 %48 }
  0x89   :  { %v123_v28 = vpop.f32.mrf.mxu0 }
  0x8a   :  { %v124_v54 = vadd.f32 %v123_v28, %v44_v53 }
  0x8c   :  { %v147_v57 = vmax.f32 %v124_v54, 0.0 }
  0x8e   :  { %v135_v26 = vpop.f32.mrf.mxu3  ;;  %v176_v7 = vpop.permute.xlu1 %175 }
  0x8f   :  { %v136_v42 = vadd.f32 %v135_v26, %v64_v38  ;;  %v171_v1 = vpop.permute.xlu0 %170 }
  0x91   :  { %v126_v32 = vpop.f32.mrf.mxu0  ;;  %v132_v41 = vpop.f32.mrf.mxu2  ;;  %v151_v48 = vmax.f32 %v136_v42, 0.0 }
  0x92   :  { %v133_v46 = vadd.f32 %v132_v41, %v59_v33  ;;  %v127_v51 = vadd.f32 %v126_v32, %v49_v50 }
  0x94   :  { %v150_v52 = vmax.f32 %v133_v46, 0.0  ;;  %v148_v56 = vmax.f32 %v127_v51, 0.0 }
  0x96   :  { %v138_v27 = vpop.f32.mrf.mxu3 }
  0x97   :  { %v139_v39 = vadd.f32 %v138_v27, %v69_v30 }
  0x99   :  { %v129_v44 = vpop.f32.mrf.mxu0  ;;  %v152_v45 = vmax.f32 %v139_v39, 0.0 }
  0x9a   :  { %v130_v49 = vadd.f32 %v129_v44, %v54_v47 }
  0x9c   :  { %v149_v55 = vmax.f32 %v130_v49, 0.0 }
  0x9e   :  { %v141_v31 = vpop.f32.mrf.mxu3 }
  0x9f   :  { %v142_v36 = vadd.f32 %v141_v31, %v74_v34 }
  0xa1   :  { %v153_v43 = vmax.f32 %v142_v36, 0.0 }
  0xa6   :  { %v144_v35 = vpop.f32.mrf.mxu3 }
  0xa7   :  { %v145_v37 = vadd.f32 %v144_v35, %v79_v29 }
  0xa9   :  { %v154_v40 = vmax.f32 %v145_v37, 0.0 }
  0xab   :  { %204 = vmatpush.msra.mxu1 %v154_v40  ;;  %287 = vmatpush.msrb.mxu2 %v154_v40 }
  0xad   :  { %205 = vmatpush.msra.mxu1 %v153_v43  ;;  %288 = vmatpush.msrb.mxu2 %v153_v43 }
  0xaf   :  { %206 = vmatpush.msra.mxu1 %v152_v45  ;;  %289 = vmatpush.msrb.mxu2 %v152_v45 }
  0xb1   :  { %207 = vmatpush.msra.mxu1 %v151_v48  ;;  %290 = vmatpush.msrb.mxu2 %v151_v48 }
  0xb3   :  { %208 = vmatpush.msra.mxu1 %v150_v52  ;;  %291 = vmatpush.msrb.mxu2 %v150_v52 }
  0xb5   :  { %209 = vmatpush.msra.mxu1 %v149_v55  ;;  %292 = vmatpush.msrb.mxu2 %v149_v55 }
  0xb7   :  { %210 = vmatpush.msra.mxu1 %v148_v56  ;;  %293 = vmatpush.msrb.mxu2 %v148_v56 }
  0xb9   :  { %211 = vmatpush.msra.mxu1 %v147_v57  ;;  %294 = vmatpush.msrb.mxu2 %v147_v57 }
  0xba   :  { %273 = vmatmul.msk.f32.vlgmr.msra.gmra.mxu1 %vm183_vm1, %v155_v58  ;;  %276 = vmatmul.msk.f32.vlgmr.msrb.gmra.mxu2 %vm183_vm1, %v158_v59 }
  0xc2   :  { %274 = vmatmul.msk.f32.gmra.mxu1 %vm183_vm1, %v156_v60 }
  0xca   :  { %275 = vmatmul.msk.f32.gmra.mxu1 %vm183_vm1, %v157_v61 }
 0x137   :  { %v213_v62 = vpop.f32.mrf.mxu1 }
 0x138   :  { %v214_v5 = vadd.f32 %v213_v62, %v166_v63 }
 0x13a   :  { %v225_v11 = vmax.f32 %v214_v5, 0.0 }
 0x13d   :  { %v222_v2 = vpop.f32.mrf.mxu2 }
 0x13e   :  { %v223_v6 = vadd.f32 %v222_v2, %v181_v4 }
 0x13f   :  { %v216_v0 = vpop.f32.mrf.mxu1 }
 0x140   :  { %v217_v3 = vadd.f32 %v216_v0, %v171_v1  ;;  %v228_v12 = vmax.f32 %v223_v6, 0.0 }
 0x142   :  { %v226_v9 = vmax.f32 %v217_v3, 0.0 }
 0x144   :  { %v230_v14 = vmul.f32 %v228_v12, %v226_v9 }
 0x147   :  { %v219_v8 = vpop.f32.mrf.mxu1 }
 0x148   :  { %v220_v10 = vadd.f32 %v219_v8, %v176_v7 }
 0x14a   :  { %v227_v13 = vmax.f32 %v220_v10, 0.0 }
 0x14c   :  { %v229_v15 = vmul.f32 %v227_v13, %v225_v11 }
 0x14e   :  { %v231_v16 = vadd.f32 %v230_v14, %v229_v15 }
 0x150   :  { %v232_v17 = vrot.slane %v231_v16, 4 }
 0x152   :  { %v233_v18 = vadd.f32 %v232_v17, %v231_v16 }
 0x154   :  { %v234_v19 = vrot.slane %v233_v18, 2 }
 0x156   :  { %v235_v20 = vadd.f32 %v234_v19, %v233_v18 }
 0x158   :  { %v236_v21 = vrot.slane %v235_v20, 1 }
 0x15a   :  { %v237_v22 = vadd.f32 %v236_v21, %v235_v20 }
 0x15c   :  { %v238_v23 = vand.u32 2147483647, %v237_v22  ;;  %vm257_vm6 = vcmp.ge.f32.partialorder %v237_v22, 0.0 }
 0x15e   :  { %v239_v24 = vsub.f32 0.0, %v238_v23 }
 0x160   :  { %v240_v25 = vmul.f32 1.442695, %v239_v24 }
 0x162   :  { %299 = vpow2.f32 %v240_v25 }
 0x168   :  { %v300_v26 = vpop.eup %299 }
 0x169   :  { %v242_v27 = vadd.f32 1.0, %v300_v26 }
 0x16b   :  { %301 = vrcp.f32 %v242_v27  ;;  %v254_v31 = vand.u32 2147483648, %v242_v27  ;;  %v252_v33 = vand.u32 2147483647, %v242_v27  ;;  %vm248_vm3 = vweird.f32 %v242_v27 }
 0x16d   :  { %v255_v35 = vor.u32 1.1754944e-38, %v254_v31  ;;  %vm253_vm5 = vcmp.eq.f32.partialorder %v252_v33, 8.507059e+37 }
 0x171   :  { %v302_v28 = vpop.eup %301 }
 0x172   :  { %v244_v29 = vmul.f32 %v302_v28, %v242_v27  ;;  %vm249_vm2 = vweird.f32 %v302_v28 }
 0x173   :  { %vm250_vm4 = vmor %vm248_vm3, %vm249_vm2 }
 0x174   :  { %v245_v30 = vsub.f32 1.0, %v244_v29 }
 0x176   :  { %v246_v32 = vmul.f32 %v302_v28, %v245_v30 }
 0x178   :  { %v247_v34 = vadd.f32 %v302_v28, %v246_v32 }
 0x17a   :  { %v251_v36 = vsel %vm250_vm4, %v302_v28, %v247_v34 }
 0x17b   :  { %v256_v37 = vsel %vm253_vm5, %v255_v35, %v251_v36 }
 0x17c   :  { %v258_v38 = vmul.f32 %v300_v26, %v256_v37 }
 0x17e   :  { %v259_v39 = vsel %vm257_vm6, %v256_v37, %v258_v38 }
 0x17f   :  { %260 = vst [vmem:[%s437_s5] sm:$0x1] %v259_v39 }

</bundles_post_ra>
